<compile_context>
chip_gen: v7x
topology: tpu7x:2x2x1
jax: 0.10.0
libtpu: 0.0.40
codegen_flags: <defaults>
</compile_context>

<pallas_src>
import math

import jax
import jax.numpy as jnp
from jax.experimental import pallas as pl
from jax.experimental.pallas import tpu as pltpu

# ----------------------------- constants (SD 2.1 config) -----------------------------
SCALING_FACTOR = 0.18215        # vae.config.scaling_factor
GUIDANCE = 4.0                  # pred_uncond + 4 * (pred_cond - pred_uncond)
NUM_TRAIN_TIMESTEPS = 1000
BETA_START, BETA_END = 0.00085, 0.012   # scaled_linear schedule
LATENT_CHANNELS = 4
VAE_DOWNSAMPLE = 8
TEXT_SEQ = 77                   # tokenizer.model_max_length
TEXT_DIM = 1024                 # CLIP-ViT-H hidden size
TIME_EMB_DIM = 128


# ----------------------------- fused kernel -----------------------------

def _sds_fused_kernel(enc_lhs_ref, patches_ref, b_enc_ref, noise_ref,
                      sacp_ref, s1m_ref, sigma2_ref,
                      temb_ref, w_sp_ref, w_time_ref, txt2_ref, w_txt_ref,
                      loss_ref):
    """VAE-encode stand-in -> *scaling_factor -> DDPM add_noise -> deduped teacher
    epsilon head -> CFG -> sigma_t^2 score gradient -> nan_to_num -> 0.5*MSE.
    Working layout is (B*4, hw): rows = (batch, latent channel), lanes = spatial.
    Everything stays in vregs; only the scalar loss leaves the kernel (SMEM)."""
    # Stand-in VAE encoder: ONE MXU pass for the whole batch (block-diagonal
    # per-pixel patchify weight built in the wrapper), bf16 operands, f32 acc.
    lat = jnp.dot(enc_lhs_ref[...], patches_ref[...],
                  preferred_element_type=jnp.float32)               # (B*4, hw) f32
    x0 = (lat + b_enc_ref[...]) * SCALING_FACTOR                    # pred_original_samples

    # DDPMScheduler.add_noise, fully vectorized with (B*4, 1) coefficient columns.
    noise = noise_ref[...]                                          # (B*4, hw) f32
    noisy = sacp_ref[...] * x0 + s1m_ref[...] * noise               # (B*4, hw) f32

    # Deduplicated teacher epsilon head: the latent+time term is shared between
    # the cond and uncond passes (computed once); the text term is batch-
    # independent and computed once for the [prompt, null] pair.
    shared = (jnp.dot(noisy.astype(jnp.bfloat16), w_sp_ref[...],
                      preferred_element_type=jnp.float32)
              + jnp.dot(temb_ref[...], w_time_ref[...],
                        preferred_element_type=jnp.float32))        # (B*4, hw) f32
    txt_terms = jnp.dot(txt2_ref[...], w_txt_ref[...],
                        preferred_element_type=jnp.float32)         # (2, hw) f32
    pred_cond = jnp.tanh(shared + txt_terms[0:1, :])
    pred_uncond = jnp.tanh(shared + txt_terms[1:2, :])
    teacher_pred = pred_uncond + GUIDANCE * (pred_cond - pred_uncond)

    # SDS loss: target = x0 - g (detached), diff = x0 - target == g, so
    # loss = 0.5*mean(g^2), g = nan_to_num(sigma_t^2 * (teacher_pred - noise)).
    # TODO(synk): torch .detach() is backward-only; wrap g in lax.stop_gradient
    # if this forward is ever differentiated.
    g = jnp.nan_to_num(sigma2_ref[...] * (teacher_pred - noise))
    loss_ref[0, 0] = 0.5 * jnp.mean(g * g)


def sds_fused_loss(enc_lhs, patches_k, b_enc_col, noise, sacp_col, s1m_col,
                   sigma2_col, temb_rep, w_sp, w_time, txt2, w_txt):
    n_in = 12
    return pl.pallas_call(
        _sds_fused_kernel,
        in_specs=[pl.BlockSpec(memory_space=pltpu.MemorySpace.VMEM)
                  for _ in range(n_in)],
        out_specs=pl.BlockSpec(memory_space=pltpu.MemorySpace.SMEM),
        out_shape=jax.ShapeDtypeStruct((1, 1), jnp.float32),
        # TODO(synk): at realistic SD latent sizes, tile w_sp/w_txt over the output-N
        # axis with a grid (mark it "parallel" so v7x's 2 TCs both get work) and set
        # vmem_limit_bytes; at this toy size a single grid-less step minimizes the
        # launch overhead that dominates wall time.
    )(enc_lhs, patches_k, b_enc_col, noise, sacp_col, s1m_col, sigma2_col,
      temb_rep, w_sp, w_time, txt2, w_txt)


# ----------------------------- glue (plain JAX, tiny arrays) -----------------------------

def alphas_cumprod():
    betas = jnp.linspace(BETA_START ** 0.5, BETA_END ** 0.5,
                         NUM_TRAIN_TIMESTEPS, dtype=jnp.float32) ** 2
    return jnp.cumprod(1.0 - betas)


def timestep_embedding(timesteps):
    half = TIME_EMB_DIM // 2
    freqs = jnp.exp(-math.log(10000.0) * jnp.arange(half, dtype=jnp.float32) / half)
    args = timesteps.astype(jnp.float32)[:, None] * freqs[None, :]
    return jnp.concatenate([jnp.sin(args), jnp.cos(args)], axis=-1)


def init_params(h_lat, w_lat_dim):
    keys = jax.random.split(jax.random.PRNGKey(42), 6)
    patch_dim = 3 * VAE_DOWNSAMPLE * VAE_DOWNSAMPLE
    hw = h_lat * w_lat_dim

    # TODO(synk): pretrained SD-2.1 VAE / UNet weights cannot be reproduced
    # in-script; compact deterministic stand-ins drive the same MXU pattern.
    w_sp = 0.02 * jax.random.normal(keys[0], (hw, hw), jnp.float32)           # spatial mix
    w_time = 0.02 * jax.random.normal(keys[1], (TIME_EMB_DIM, hw), jnp.float32)
    w_txt = 0.02 * jax.random.normal(keys[2], (TEXT_DIM, hw), jnp.float32)

    # TODO(synk): tokenizer + CLIP text encoder have no Pallas equivalent;
    # deterministic stand-in embeddings of the real shape (1, 77, 1024), pooled
    # once here (constant per prompt) instead of per forward step.
    prompt_embeds = jax.random.normal(keys[3], (1, TEXT_SEQ, TEXT_DIM), jnp.float32)
    null_embeds = jax.random.normal(keys[4], (1, TEXT_SEQ, TEXT_DIM), jnp.float32)
    txt2 = jnp.concatenate([prompt_embeds.mean(axis=1), null_embeds.mean(axis=1)], axis=0)

    return {
        "w_enc_t": 0.05 * jax.random.normal(keys[5], (LATENT_CHANNELS, patch_dim),
                                            jnp.float32),          # per-pixel VAE stand-in
        "b_enc": jnp.zeros((LATENT_CHANNELS, 1), jnp.float32),
        "w_sp": w_sp.astype(jnp.bfloat16),
        "w_time": w_time.astype(jnp.bfloat16),
        "w_txt": w_txt.astype(jnp.bfloat16),
        "txt2": txt2.astype(jnp.bfloat16),      # rows: [prompt_pooled, null_pooled]
    }


def sds_wrapper_forward(image, params, rng):
    B, C, H, W = image.shape

    # torch.nn.functional.interpolate(image, scale_factor=4)  (nearest, default)
    up = jnp.repeat(jnp.repeat(image, 4, axis=2), 4, axis=3)
    Hu, Wu = up.shape[2], up.shape[3]
    hl, wl = Hu // VAE_DOWNSAMPLE, Wu // VAE_DOWNSAMPLE
    hw = hl * wl
    pd = C * VAE_DOWNSAMPLE * VAE_DOWNSAMPLE

    # Patchify into the kernel's K-major layout: rows = (batch, patch feature),
    # lanes = latent spatial positions.  All layout plumbing lives here (XLA, tiny).
    patches = up.reshape(B, C, hl, VAE_DOWNSAMPLE, wl, VAE_DOWNSAMPLE)
    patches = patches.transpose(0, 1, 3, 5, 2, 4).reshape(B, pd, hw)
    patches_k = patches.reshape(B * pd, hw).astype(jnp.bfloat16)        # (B*pd, hw)

    # Block-diagonal encoder weight: one (B*4, B*pd) @ (B*pd, hw) MXU pass yields the
    # per-pixel VAE stand-in latent for the whole batch, already in the kernel's
    # (batch*channel, hw) layout — no per-batch grid, no in-kernel reshape.
    enc_lhs = jnp.kron(jnp.eye(B, dtype=jnp.float32),
                       params["w_enc_t"]).astype(jnp.bfloat16)          # (B*4, B*pd)
    b_enc_col = jnp.tile(params["b_enc"], (B, 1))                       # (B*4, 1) f32

    k_noise, k_t = jax.random.split(rng)
    noise = jax.random.normal(k_noise, (B * LATENT_CHANNELS, hw), jnp.float32)

    # timesteps ~ randint(0.02*1000, 0.981*1000) = [20, 981)
    timesteps = jax.random.randint(k_t, (B,), 20, 981)
    acp_t = alphas_cumprod()[timesteps]
    sacp_col = jnp.repeat(jnp.sqrt(acp_t), LATENT_CHANNELS)[:, None]        # (B*4, 1)
    s1m_col = jnp.repeat(jnp.sqrt(1.0 - acp_t), LATENT_CHANNELS)[:, None]   # (B*4, 1)
    sigma2_col = jnp.repeat(1.0 - acp_t, LATENT_CHANNELS)[:, None]          # sigma_t**2

    temb_rep = jnp.repeat(timestep_embedding(timesteps), LATENT_CHANNELS,
                          axis=0).astype(jnp.bfloat16)                      # (B*4, 128)

    loss = sds_fused_loss(enc_lhs, patches_k, b_enc_col, noise,
                          sacp_col, s1m_col, sigma2_col, temb_rep,
                          params["w_sp"], params["w_time"],
                          params["txt2"], params["w_txt"])
    return loss[0, 0]


# ----------------------------- main -----------------------------

if __name__ == "__main__":
    B, C, H, W = 2, 3, 16, 16           # image: (2, 3, 16, 16), NCHW
    key = jax.random.PRNGKey(0)
    k_img, k_fwd = jax.random.split(key)
    image = jax.random.normal(k_img, (B, C, H, W), jnp.float32)

    hl = (H * 4) // VAE_DOWNSAMPLE
    wl = (W * 4) // VAE_DOWNSAMPLE
    params = init_params(hl, wl)

    loss = jax.jit(sds_wrapper_forward)(image, params, k_fwd)
    loss = jax.block_until_ready(loss)
    assert jnp.isfinite(loss)
    print("KERNEL_OK")
</pallas_src>

<mosaic_0001>
module attributes {stable_mosaic.version = 11 : i64} {
  func.func @_sds_fused_kernel(%arg0: memref<8x384xbf16, #tpu.memory_space<vmem>>, %arg1: memref<384x64xbf16, #tpu.memory_space<vmem>>, %arg2: memref<8x1xf32, #tpu.memory_space<vmem>>, %arg3: memref<8x64xf32, #tpu.memory_space<vmem>>, %arg4: memref<8x1xf32, #tpu.memory_space<vmem>>, %arg5: memref<8x1xf32, #tpu.memory_space<vmem>>, %arg6: memref<8x1xf32, #tpu.memory_space<vmem>>, %arg7: memref<8x128xbf16, #tpu.memory_space<vmem>>, %arg8: memref<64x64xbf16, #tpu.memory_space<vmem>>, %arg9: memref<128x64xbf16, #tpu.memory_space<vmem>>, %arg10: memref<2x1024xbf16, #tpu.memory_space<vmem>>, %arg11: memref<1024x64xbf16, #tpu.memory_space<vmem>>, %arg12: memref<1x1xf32, #tpu.memory_space<smem>>) attributes {dimension_semantics = [], scalar_prefetch = 0 : i64, scratch_operands = 0 : i64, tpu.core_type = #tpu.core_type<tc>} {
    %c0 = arith.constant 0 : index
    %c0_0 = arith.constant 0 : index
    %0 = vector.load %arg0[%c0, %c0_0] : memref<8x384xbf16, #tpu.memory_space<vmem>>, vector<8x384xbf16>
    %c0_1 = arith.constant 0 : index
    %c0_2 = arith.constant 0 : index
    %1 = vector.load %arg1[%c0_1, %c0_2] : memref<384x64xbf16, #tpu.memory_space<vmem>>, vector<384x64xbf16>
    %cst = arith.constant dense<0.000000e+00> : vector<8x64xf32>
    %2 = tpu.matmul %0, %1, %cst {dimension_numbers = #tpu.dot_dimension_numbers<[1], [0], [0], [1], [0, 0, 1, 1], [], []>} : vector<8x384xbf16>, vector<384x64xbf16>, vector<8x64xf32> -> vector<8x64xf32>
    %c0_3 = arith.constant 0 : index
    %c0_4 = arith.constant 0 : index
    %3 = vector.load %arg2[%c0_3, %c0_4] : memref<8x1xf32, #tpu.memory_space<vmem>>, vector<8x1xf32>
    %4 = vector.broadcast %3 : vector<8x1xf32> to vector<8x64xf32>
    %5 = arith.addf %2, %4 : vector<8x64xf32>
    %cst_5 = arith.constant 1.821500e-01 : f32
    %6 = vector.broadcast %cst_5 : f32 to vector<8x64xf32>
    %7 = arith.mulf %5, %6 : vector<8x64xf32>
    %c0_6 = arith.constant 0 : index
    %c0_7 = arith.constant 0 : index
    %8 = vector.load %arg3[%c0_6, %c0_7] : memref<8x64xf32, #tpu.memory_space<vmem>>, vector<8x64xf32>
    %c0_8 = arith.constant 0 : index
    %c0_9 = arith.constant 0 : index
    %9 = vector.load %arg4[%c0_8, %c0_9] : memref<8x1xf32, #tpu.memory_space<vmem>>, vector<8x1xf32>
    %10 = vector.broadcast %9 : vector<8x1xf32> to vector<8x64xf32>
    %11 = arith.mulf %10, %7 : vector<8x64xf32>
    %c0_10 = arith.constant 0 : index
    %c0_11 = arith.constant 0 : index
    %12 = vector.load %arg5[%c0_10, %c0_11] : memref<8x1xf32, #tpu.memory_space<vmem>>, vector<8x1xf32>
    %13 = vector.broadcast %12 : vector<8x1xf32> to vector<8x64xf32>
    %14 = arith.mulf %13, %8 : vector<8x64xf32>
    %15 = arith.addf %11, %14 : vector<8x64xf32>
    %16 = arith.truncf %15 : vector<8x64xf32> to vector<8x64xbf16>
    %c0_12 = arith.constant 0 : index
    %c0_13 = arith.constant 0 : index
    %17 = vector.load %arg8[%c0_12, %c0_13] : memref<64x64xbf16, #tpu.memory_space<vmem>>, vector<64x64xbf16>
    %cst_14 = arith.constant dense<0.000000e+00> : vector<8x64xf32>
    %18 = tpu.matmul %16, %17, %cst_14 {dimension_numbers = #tpu.dot_dimension_numbers<[1], [0], [0], [1], [0, 0, 1, 1], [], []>} : vector<8x64xbf16>, vector<64x64xbf16>, vector<8x64xf32> -> vector<8x64xf32>
    %c0_15 = arith.constant 0 : index
    %c0_16 = arith.constant 0 : index
    %19 = vector.load %arg7[%c0_15, %c0_16] : memref<8x128xbf16, #tpu.memory_space<vmem>>, vector<8x128xbf16>
    %c0_17 = arith.constant 0 : index
    %c0_18 = arith.constant 0 : index
    %20 = vector.load %arg9[%c0_17, %c0_18] : memref<128x64xbf16, #tpu.memory_space<vmem>>, vector<128x64xbf16>
    %cst_19 = arith.constant dense<0.000000e+00> : vector<8x64xf32>
    %21 = tpu.matmul %19, %20, %cst_19 {dimension_numbers = #tpu.dot_dimension_numbers<[1], [0], [0], [1], [0, 0, 1, 1], [], []>} : vector<8x128xbf16>, vector<128x64xbf16>, vector<8x64xf32> -> vector<8x64xf32>
    %22 = arith.addf %18, %21 : vector<8x64xf32>
    %c0_20 = arith.constant 0 : index
    %c0_21 = arith.constant 0 : index
    %23 = vector.load %arg10[%c0_20, %c0_21] : memref<2x1024xbf16, #tpu.memory_space<vmem>>, vector<2x1024xbf16>
    %c0_22 = arith.constant 0 : index
    %c0_23 = arith.constant 0 : index
    %24 = vector.load %arg11[%c0_22, %c0_23] : memref<1024x64xbf16, #tpu.memory_space<vmem>>, vector<1024x64xbf16>
    %cst_24 = arith.constant dense<0.000000e+00> : vector<2x64xf32>
    %25 = tpu.matmul %23, %24, %cst_24 {dimension_numbers = #tpu.dot_dimension_numbers<[1], [0], [0], [1], [0, 0, 1, 1], [], []>} : vector<2x1024xbf16>, vector<1024x64xbf16>, vector<2x64xf32> -> vector<2x64xf32>
    %26 = vector.extract_strided_slice %25 {offsets = [0, 0], sizes = [1, 64], strides = [1, 1]} : vector<2x64xf32> to vector<1x64xf32>
    %27 = vector.broadcast %26 : vector<1x64xf32> to vector<8x64xf32>
    %28 = arith.addf %22, %27 : vector<8x64xf32>
    %29 = math.tanh %28 : vector<8x64xf32>
    %30 = vector.extract_strided_slice %25 {offsets = [1, 0], sizes = [1, 64], strides = [1, 1]} : vector<2x64xf32> to vector<1x64xf32>
    %31 = vector.broadcast %30 : vector<1x64xf32> to vector<8x64xf32>
    %32 = arith.addf %22, %31 : vector<8x64xf32>
    %33 = math.tanh %32 : vector<8x64xf32>
    %34 = arith.subf %29, %33 : vector<8x64xf32>
    %cst_25 = arith.constant 4.000000e+00 : f32
    %35 = vector.broadcast %cst_25 : f32 to vector<8x64xf32>
    %36 = arith.mulf %35, %34 : vector<8x64xf32>
    %37 = arith.addf %33, %36 : vector<8x64xf32>
    %c0_26 = arith.constant 0 : index
    %c0_27 = arith.constant 0 : index
    %38 = vector.load %arg6[%c0_26, %c0_27] : memref<8x1xf32, #tpu.memory_space<vmem>>, vector<8x1xf32>
    %39 = arith.subf %37, %8 : vector<8x64xf32>
    %40 = vector.broadcast %38 : vector<8x1xf32> to vector<8x64xf32>
    %41 = arith.mulf %40, %39 : vector<8x64xf32>
    %42 = arith.cmpf one, %41, %41 : vector<8x64xf32>
    %cst_28 = arith.constant 0.000000e+00 : f32
    %43 = vector.broadcast %cst_28 : f32 to vector<8x64xf32>
    %44 = arith.select %42, %43, %41 : vector<8x64xi1>, vector<8x64xf32>
    %cst_29 = arith.constant 0x7F800000 : f32
    %45 = vector.broadcast %cst_29 : f32 to vector<8x64xf32>
    %46 = arith.cmpf oeq, %44, %45 : vector<8x64xf32>
    %cst_30 = arith.constant 3.40282347E+38 : f32
    %47 = vector.broadcast %cst_30 : f32 to vector<8x64xf32>
    %48 = arith.select %46, %47, %44 : vector<8x64xi1>, vector<8x64xf32>
    %cst_31 = arith.constant 0xFF800000 : f32
    %49 = vector.broadcast %cst_31 : f32 to vector<8x64xf32>
    %50 = arith.cmpf oeq, %48, %49 : vector<8x64xf32>
    %cst_32 = arith.constant -3.40282347E+38 : f32
    %51 = vector.broadcast %cst_32 : f32 to vector<8x64xf32>
    %52 = arith.select %50, %51, %48 : vector<8x64xi1>, vector<8x64xf32>
    %53 = arith.mulf %52, %52 : vector<8x64xf32>
    %54 = vector.shape_cast %53 : vector<8x64xf32> to vector<1x8x64xf32>
    %cst_33 = arith.constant dense<0.000000e+00> : vector<1xf32>
    %55 = vector.multi_reduction <add>, %54, %cst_33 [1, 2] : vector<1x8x64xf32> to vector<1xf32>
    %56 = vector.shape_cast %55 : vector<1xf32> to vector<1x1x1xf32>
    %57 = vector.extract %56[0, 0, 0] : f32 from vector<1x1x1xf32>
    %cst_34 = arith.constant 5.120000e+02 : f32
    %58 = arith.divf %57, %cst_34 : f32
    %cst_35 = arith.constant 5.000000e-01 : f32
    %59 = arith.mulf %cst_35, %58 : f32
    %c0_36 = arith.constant 0 : index
    %c0_37 = arith.constant 0 : index
    %60 = memref.load %arg12[%c0_36, %c0_37] : memref<1x1xf32, #tpu.memory_space<smem>>
    memref.store %59, %arg12[%c0_36, %c0_37] : memref<1x1xf32, #tpu.memory_space<smem>>
    return
  }
}

</mosaic_0001>

<bundles_post_ra>
// kernel: sds_wrapper_forward.21
= control target key start
LH: loop header
LB: loop body
LE: loop exit
PB: predicated region body
PF: predicated region fallthrough
CT: control target
= control target key end

     0   :  { %v1745_v2 = vmov 0.0   ;;  %vm1746_vm0 = vmmov 0   ;;  %v1747_v5 = vmov 0   ;;  %v1748_v35 = vmov 1966171168   ;;  %s2209_s0 = inlined_call_operand.vmem [shape: bf16[8,384], index: 0, kind: input, shape index: {}]   ;;  %s2210_s1 = inlined_call_operand.vmem [shape: bf16[384,64], index: 1, kind: input, shape index: {}]   ;;  %s2211_s2 = inlined_call_operand.vmem [shape: f32[8,1], index: 2, kind: input, shape index: {}]   ;;  %s2212_s3 = inlined_call_operand.vmem [shape: f32[8,64], index: 3, kind: input, shape index: {}]   ;;  %s2213_s4 = inlined_call_operand.vmem [shape: f32[8,1], index: 4, kind: input, shape index: {}]   ;;  %s2214_s5 = inlined_call_operand.vmem [shape: f32[8,1], index: 5, kind: input, shape index: {}]   ;;  %s2215_s6 = inlined_call_operand.vmem [shape: f32[8,1], index: 6, kind: input, shape index: {}]   ;;  %s2216_s7 = inlined_call_operand.vmem [shape: bf16[8,128], index: 7, kind: input, shape index: {}]   ;;  %s2217_s8 = inlined_call_operand.vmem [shape: bf16[64,64], index: 8, kind: input, shape index: {}]   ;;  %s2218_s9 = inlined_call_operand.vmem [shape: bf16[128,64], index: 9, kind: input, shape index: {}]   ;;  %s2219_s10 = inlined_call_operand.vmem [shape: bf16[2,1024], index: 10, kind: input, shape index: {}]   ;;  %s2220_s11 = inlined_call_operand.vmem [shape: bf16[1024,64], index: 11, kind: input, shape index: {}]   ;;  %s2221_s12 = inlined_call_operand.hbm [shape: f32[1,1], index: 12, kind: output, shape index: {}]  }
   0x1   :  { %v1625_v0 = vld [vmem:[%s2210_s1 + $0x40] sm:$0xff]   ;;  %1560 = vmatprep.subr.bf16.mxu1 %v1745_v2  ;;  %1576 = vmatprep.mubr.msk.bf16.mxu1 %vm1746_vm0, %v1745_v2  ;;  %v1628_v4 = vld [vmem:[%s2210_s1 + $0x48] sm:$0xff]   ;;  %v1631_v8 = vld [vmem:[%s2210_s1 + $0x50] sm:$0xff]   ;;  %v665_v36 = vunpack.c.l.s4 %v1748_v35  ;;  %v667_v37 = vlaneseq }
   0x2   :  { %v1626_v1 = vld [vmem:[%s2210_s1] sm:$0xff]   ;;  %1427 = vmatprep.subr.bf16.mxu0 %v1625_v0  ;;  %1623 = vset.pattern.permute.xlu0 %v1747_v5  ;;  %v1629_v6 = vld [vmem:[%s2210_s1 + $0x8] sm:$0xff]   ;;  %v1632_v9 = vld [vmem:[%s2210_s1 + $0x10] sm:$0xff]  }
   0x3   :  { %v1627_v3 = vld [vmem:[%s2210_s1 + $0x80] sm:$0xff]   ;;  %1428 = vmatpush3.bf16.msra.mxu0 %v1626_v1  ;;  %1624 = vset.pattern.permute.xlu1 %v1747_v5  ;;  %v1630_v7 = vld [vmem:[%s2210_s1 + $0x88] sm:$0xff]   ;;  %v1633_v10 = vld [vmem:[%s2210_s1 + $0x90] sm:$0xff]   ;;  %v666_v40 = vunpack.c.0.s8 %v665_v36  ;;  %v1925_v41 = vshrl.u32 %v667_v37, 7 }
   0x4   :  { %1561 = vmatpush3.bf16.msra.mxu1 %v1627_v3  ;;  %1429 = vmatprep.subr.bf16.mxu0 %v1628_v4  ;;  %v1634_v11 = vld [vmem:[%s2210_s1 + $0x58] sm:$0xff]   ;;  %v1637_v14 = vld [vmem:[%s2210_s1 + $0x60] sm:$0xff]   ;;  %v1640_v17 = vld [vmem:[%s2210_s1 + $0x68] sm:$0xff]  }
   0x5   :  { %1562 = vmatprep.subr.bf16.mxu1 %v1745_v2  ;;  %v1635_v12 = vld [vmem:[%s2210_s1 + $0x18] sm:$0xff]   ;;  %v1638_v15 = vld [vmem:[%s2210_s1 + $0x20] sm:$0xff]   ;;  %v1641_v18 = vld [vmem:[%s2210_s1 + $0x28] sm:$0xff]   ;;  %v1936_v44 = vsub.s32 %v666_v40, %v1925_v41 }
   0x6   :  { %v1636_v13 = vld [vmem:[%s2210_s1 + $0x98] sm:$0xff]   ;;  %v1639_v16 = vld [vmem:[%s2210_s1 + $0xa0] sm:$0xff]   ;;  %v1642_v19 = vld [vmem:[%s2210_s1 + $0xa8] sm:$0xff]  }
   0x7   :  { %1430 = vmatpush3.bf16.msra.mxu0 %v1629_v6  ;;  %v1643_v20 = vld [vmem:[%s2210_s1 + $0x70] sm:$0xff]   ;;  %v43_v22 = vld [vmem:[%s2209_s0] sm:$0xff]  ;;  %v1646_v24 = vld [vmem:[%s2210_s1 + $0x78] sm:$0xff]  }
   0x8   :  { %1563 = vmatpush3.bf16.msra.mxu1 %v1630_v7  ;;  %1431 = vmatprep.subr.bf16.mxu0 %v1631_v8  ;;  %v1644_v21 = vld [vmem:[%s2210_s1 + $0x30] sm:$0xff]   ;;  %v1324_v25 = vcombine.high %v43_v22, %v43_v22  ;;  %v1647_v26 = vld [vmem:[%s2210_s1 + $0x38] sm:$0xff]   ;;  %v93_v27 = vld [vmem:[%s2211_s2] sm:$0xff]  ;;  %v1323_v33 = vcombine.low %v43_v22, %v43_v22 }
   0x9   :  { %1564 = vmatprep.subr.bf16.mxu1 %v1745_v2  ;;  %v1645_v23 = vld [vmem:[%s2210_s1 + $0xb0] sm:$0xff]   ;;  %v343_v28 = vld [vmem:[%s2214_s5] sm:$0xff]  ;;  %v1650_v29 = vld [vmem:[%s2210_s1 + $0xb8] sm:$0xff]   ;;  %96 = vperm.xlu0 %1623, %v93_v27  }
   0xa   :  { %286 = vmatprep.mubr.bf16.mxu0 %v1324_v25  ;;  %v336_v30 = vld [vmem:[%s2213_s4] sm:$0xff]  ;;  %346 = vperm.xlu1 %1624, %v343_v28   ;;  %v1651_v34 = vld [vmem:[%s2209_s0 + $0x8] ss:$0 sps:$4 sm:$0xff]   ;;  %v1656_v43 = vld [vmem:[%s2220_s11 + $0x50] sm:$0xff]  }
   0xb   :  { %1432 = vmatpush3.bf16.msra.mxu0 %v1632_v9  ;;  %v1279_v31 = vld [vmem:[%s2215_s6] sm:$0xff]  ;;  %v1654_v39 = vld [vmem:[%s2220_s11 + $0x48] sm:$0xff]   ;;  %v1657_v45 = vld [vmem:[%s2220_s11 + $0x10] sm:$0xff]  }
   0xc   :  { %1565 = vmatpush3.bf16.msra.mxu1 %v1633_v10  ;;  %1433 = vmatprep.subr.bf16.mxu0 %v1634_v11  ;;  %v1652_v32 = vld [vmem:[%s2220_s11 + $0x40] sm:$0xff]   ;;  %v1655_v42 = vld [vmem:[%s2220_s11 + $0x8] sm:$0xff]   ;;  %v1658_v46 = vld [vmem:[%s2220_s11 + $0x58] sm:$0xff]  }
   0xd   :  { %1566 = vmatprep.subr.bf16.mxu1 %v1745_v2  ;;  %339 = vperm.xlu0 %1623, %v336_v30   ;;  %v1653_v38 = vld [vmem:[%s2220_s11] sm:$0xff]   ;;  %v1659_v49 = vld [vmem:[%s2220_s11 + $0x18] sm:$0xff]   ;;  %v1662_v54 = vld [vmem:[%s2220_s11 + $0x68] sm:$0xff]  }
   0xe   :  { %1283 = vperm.xlu1 %1624, %v1279_v31   ;;  %v1947_v47 = vld [vmem:[%s2219_s10] sm:$0xff]  ;;  %v1663_v56 = vld [vmem:[%s2220_s11 + $0x28] sm:$0xff]   ;;  %v1664_v57 = vld [vmem:[%s2220_s11 + $0x70] sm:$0xff]  }
   0xf   :  { %1434 = vmatpush3.bf16.msra.mxu0 %v1635_v12  ;;  %v670_v48 = vrot.slane %v1947_v47, %v1936_v44  ;;  %v1660_v50 = vld [vmem:[%s2220_s11 + $0x60] sm:$0xff]   ;;  %v1680_v58 = vld [vmem:[%s2218_s9 + $0x8] sm:$0xff]   ;;  %v1665_v59 = vld [vmem:[%s2220_s11 + $0x30] sm:$0xff]  }
  0x10   :  { %1567 = vmatpush3.bf16.msra.mxu1 %v1636_v13  ;;  %1435 = vmatprep.subr.bf16.mxu0 %v1637_v14  ;;  %v1661_v53 = vld [vmem:[%s2220_s11 + $0x20] sm:$0xff]   ;;  %v1666_v60 = vld [vmem:[%s2220_s11 + $0x78] sm:$0xff]   ;;  %v1683_v61 = vld [vmem:[%s2218_s9 + $0x10] sm:$0xff]  }
  0x11   :  { %1568 = vmatprep.subr.bf16.mxu1 %v1745_v2  ;;  %v678_v51 = vcombine.high %v670_v48, %v670_v48  ;;  %v1677_v55 = vld [vmem:[%s2218_s9] sm:$0xff]   ;;  %v1667_v62 = vld [vmem:[%s2220_s11 + $0x38] sm:$0xff]   ;;  %v686_v1 = vrot.slane %v670_v48, %v1936_v44  ;;  %v1671_v4 = vld [vmem:[%s2220_s11 + $0xc8] sm:$0xff]  }
  0x12   :  { %v1669_v63 = vld [vmem:[%s2220_s11 + $0xc0] sm:$0xff]   ;;  %v1686_v0 = vld [vmem:[%s2218_s9 + $0x18] sm:$0xff]   ;;  %v1672_v7 = vld [vmem:[%s2220_s11 + $0x88] sm:$0xff]  }
  0x13   :  { %1436 = vmatpush3.bf16.msra.mxu0 %v1638_v15  ;;  %v700_v52 = vrot.slane %v678_v51, %v1936_v44  ;;  %v1670_v3 = vld [vmem:[%s2220_s11 + $0x80] sm:$0xff]   ;;  %v1673_v8 = vld [vmem:[%s2220_s11 + $0xd0] sm:$0xff]   ;;  %v1690_v9 = vld [vmem:[%s2218_s9 + $0x28] sm:$0xff]  }
  0x14   :  { %1569 = vmatpush3.bf16.msra.mxu1 %v1639_v16  ;;  %1437 = vmatprep.subr.bf16.mxu0 %v1640_v17  ;;  %v1689_v6 = vld [vmem:[%s2218_s9 + $0x20] sm:$0xff]   ;;  %v1674_v10 = vld [vmem:[%s2220_s11 + $0x90] sm:$0xff]   ;;  %v1675_v11 = vld [vmem:[%s2220_s11 + $0xd8] sm:$0xff]  }
  0x15   :  { %1570 = vmatprep.subr.bf16.mxu1 %v1745_v2  ;;  %v710_v5 = vcombine.high %v700_v52, %v700_v52  ;;  %v1691_v12 = vld [vmem:[%s2218_s9 + $0x30] sm:$0xff]   ;;  %v1676_v13 = vld [vmem:[%s2220_s11 + $0x98] sm:$0xff]   ;;  %v1678_v14 = vld [vmem:[%s2220_s11 + $0xe0] sm:$0xff]  }
  0x16   :  { %v1692_v15 = vld [vmem:[%s2218_s9 + $0x38] sm:$0xff]   ;;  %v1679_v16 = vld [vmem:[%s2220_s11 + $0xa0] sm:$0xff]   ;;  %v1681_v17 = vld [vmem:[%s2220_s11 + $0xe8] sm:$0xff]  }
  0x17   :  { %1438 = vmatpush3.bf16.msra.mxu0 %v1641_v18  ;;  %v1682_v18 = vld [vmem:[%s2220_s11 + $0xa8] sm:$0xff]  }
  0x18   :  { %1571 = vmatpush3.bf16.msra.mxu1 %v1642_v19  ;;  %1439 = vmatprep.subr.bf16.mxu0 %v1643_v20  ;;  %v1684_v19 = vld [vmem:[%s2220_s11 + $0xf0] sm:$0xff]  }
  0x19   :  { %1572 = vmatprep.subr.bf16.mxu1 %v1745_v2  ;;  %v1685_v20 = vld [vmem:[%s2220_s11 + $0xb0] sm:$0xff]  }
  0x1b   :  { %1440 = vmatpush3.bf16.msra.mxu0 %v1644_v21  ;;  %v1687_v21 = vld [vmem:[%s2220_s11 + $0xf8] sm:$0xff]  }
  0x1c   :  { %1573 = vmatpush3.bf16.msra.mxu1 %v1645_v23  ;;  %1441 = vmatprep.subr.bf16.mxu0 %v1646_v24 }
  0x1d   :  { %1574 = vmatprep.subr.bf16.mxu1 %v1745_v2 }
  0x1f   :  { %1442 = vmatpush3.bf16.msra.mxu0 %v1647_v26 }
  0x20   :  { %1575 = vmatpush3.bf16.msra.mxu1 %v1650_v29  ;;  %1580 = vmatprep.subr.bf16.mxu0 %v1745_v2 }
  0x21   :  { %1472 = vmatprep.subr.bf16.mxu1 %v1652_v32 }
  0x22   :  { %287 = vmatmul.mubr.bf16.vlgmr.msra.gmra.mrb[0].mxu0 %v1323_v33 }
  0x23   :  { %1577 = vmatmul.mubr.bf16.vlgmr.msra.gmra.mrb[0].mxu1 %v1651_v34  ;;  %1596 = vmatprep.mubr.msk.bf16.mxu0 %vm1746_vm0, %v1745_v2 }
  0x24   :  { %1473 = vmatpush3.bf16.msra.mxu1 %v1653_v38  ;;  %1136 = vmatprep.mubr.bf16.mxu1 %v700_v52 }
  0x25   :  { %1474 = vmatprep.subr.bf16.mxu1 %v1654_v39  ;;  %1581 = vmatpush3.bf16.msra.mxu0 %v1677_v55 }
  0x26   :  { %1582 = vmatprep.subr.bf16.mxu0 %v1745_v2 }
  0x28   :  { %1475 = vmatpush3.bf16.msra.mxu1 %v1655_v42 }
  0x29   :  { %1476 = vmatprep.subr.bf16.mxu1 %v1656_v43  ;;  %1583 = vmatpush3.bf16.msra.mxu0 %v1680_v58 }
  0x2a   :  { %1584 = vmatprep.subr.bf16.mxu0 %v1745_v2 }
  0x2c   :  { %1477 = vmatpush3.bf16.msra.mxu1 %v1657_v45 }
  0x2d   :  { %1478 = vmatprep.subr.bf16.mxu1 %v1658_v46  ;;  %1585 = vmatpush3.bf16.msra.mxu0 %v1683_v61 }
  0x2e   :  { %1586 = vmatprep.subr.bf16.mxu0 %v1745_v2 }
  0x30   :  { %1479 = vmatpush3.bf16.msra.mxu1 %v1659_v49 }
  0x31   :  { %1480 = vmatprep.subr.bf16.mxu1 %v1660_v50  ;;  %1587 = vmatpush3.bf16.msra.mxu0 %v1686_v0 }
  0x32   :  { %1588 = vmatprep.subr.bf16.mxu0 %v1745_v2 }
  0x34   :  { %1481 = vmatpush3.bf16.msra.mxu1 %v1661_v53 }
  0x35   :  { %1482 = vmatprep.subr.bf16.mxu1 %v1662_v54  ;;  %1589 = vmatpush3.bf16.msra.mxu0 %v1689_v6 }
  0x36   :  { %1590 = vmatprep.subr.bf16.mxu0 %v1745_v2 }
  0x38   :  { %1483 = vmatpush3.bf16.msra.mxu1 %v1663_v56 }
  0x39   :  { %1484 = vmatprep.subr.bf16.mxu1 %v1664_v57  ;;  %1591 = vmatpush3.bf16.msra.mxu0 %v1690_v9 }
  0x3a   :  { %1592 = vmatprep.subr.bf16.mxu0 %v1745_v2 }
  0x3c   :  { %1485 = vmatpush3.bf16.msra.mxu1 %v1665_v59 }
  0x3d   :  { %1486 = vmatprep.subr.bf16.mxu1 %v1666_v60  ;;  %1593 = vmatpush3.bf16.msra.mxu0 %v1691_v12 }
  0x3e   :  { %1594 = vmatprep.subr.bf16.mxu0 %v1745_v2 }
  0x40   :  { %1487 = vmatpush3.bf16.msra.mxu1 %v1667_v62 }
  0x41   :  { %1494 = vmatprep.subr.bf16.mxu1 %v1669_v63  ;;  %1595 = vmatpush3.bf16.msra.mxu0 %v1692_v15 }
  0x42   :  { %1600 = vmatprep.subr.bf16.mxu0 %v1745_v2 }
  0x43   :  { %1137 = vmatmul.mubr.bf16.vlgmr.msra.gmra.mrb[4].mxu1 %v686_v1 }
  0x44   :  { %1495 = vmatpush3.bf16.msra.mxu1 %v1670_v3  ;;  %1176 = vmatprep.mubr.bf16.mxu1 %v710_v5 }
  0x45   :  { %1496 = vmatprep.subr.bf16.mxu1 %v1671_v4 }
  0x48   :  { %1497 = vmatpush3.bf16.msra.mxu1 %v1672_v7 }
  0x49   :  { %1498 = vmatprep.subr.bf16.mxu1 %v1673_v8 }
  0x4c   :  { %1499 = vmatpush3.bf16.msra.mxu1 %v1674_v10 }
  0x4d   :  { %1500 = vmatprep.subr.bf16.mxu1 %v1675_v11 }
  0x50   :  { %1501 = vmatpush3.bf16.msra.mxu1 %v1676_v13 }
  0x51   :  { %1502 = vmatprep.subr.bf16.mxu1 %v1678_v14 }
  0x54   :  { %1503 = vmatpush3.bf16.msra.mxu1 %v1679_v16 }
  0x55   :  { %1504 = vmatprep.subr.bf16.mxu1 %v1681_v17 }
  0x58   :  { %1505 = vmatpush3.bf16.msra.mxu1 %v1682_v18 }
  0x59   :  { %1506 = vmatprep.subr.bf16.mxu1 %v1684_v19 }
  0x5a   :  { %17 = vsyncpa [#allocation3], 0  ;;  %v1688_v22 = vld [vmem:[%s2220_s11 + $0xb8] sm:$0xff]   ;;  %v708_v23 = vcombine.high %v686_v1, %v686_v1  ;;  %v1693_v24 = vld [vmem:[%s2217_s8] sm:$0xff]   ;;  %v663_v40 = vcombine.high %v1947_v47, %v1947_v47  ;;  %vm489_vm1 = vcmask 523264   ;;  %s1733_s1 = scalar_lea.hbm %s2221_s12, 16 }
  0x5b   :  { %v360_v25 = vld [vmem:[%s2216_s7] sm:$0xf]  ;;  %v1694_v26 = vld [vmem:[%s2217_s8 + $0x8] sm:$0xff]   ;;  %v1695_v27 = vld [vmem:[%s2217_s8 + $0x10] sm:$0xff]   ;;  %p1734_p0 = scmp.ne.s32.totalorder %s2221_s12, %s1733_s1  ;;  %p1737_p1 = scmp.lt.u32.totalorder %s1733_s1, %s2221_s12 }
  0x5c   :  { %1507 = vmatpush3.bf16.msra.mxu1 %v1685_v20  ;;  %1597 = vmatmul.mubr.bf16.vlgmr.msra.gmra.mrb[4].mxu0 %v360_v25  ;;  %v1696_v28 = vld [vmem:[%s2217_s8 + $0x18] sm:$0xff]   ;;  %v1697_v29 = vld [vmem:[%s2220_s11 + $0x1c0] sm:$0xff]   ;;  %v1703_v32 = vld [vmem:[%s2220_s11 + $0x188] sm:$0xff]   ;;  %v677_v46 = vrot.slane %v663_v40, %v1936_v44 }
  0x5d   :  { %1508 = vmatprep.subr.bf16.mxu1 %v1687_v21  ;;  %1601 = vmatpush3.bf16.msra.mxu0 %v1693_v24  ;;  %v1698_v30 = vld [vmem:[%s2220_s11 + $0x140] sm:$0xff]   ;;  %v1705_v33 = vld [vmem:[%s2220_s11 + $0x1d0] sm:$0xff]   ;;  %v1709_v35 = vld [vmem:[%s2220_s11 + $0x1d8] sm:$0xff]   ;;  %p1739_p2 = pnand %p1737_p1, %p1734_p0 }
  0x5e   :  { %1608 = vmatprep.mubr.msk.bf16.mxu0 %vm1746_vm0, %v1745_v2  ;;  %1602 = vmatprep.subr.bf16.mxu0 %v1745_v2  ;;  %v1699_v31 = vld [vmem:[%s2220_s11 + $0x180] sm:$0xff]   ;;  %v1707_v34 = vld [vmem:[%s2220_s11 + $0x190] sm:$0xff]   ;;  %v1711_v36 = vld [vmem:[%s2220_s11 + $0x198] sm:$0xff]   ;;  %v679_v48 = vcombine.high %v677_v46, %v677_v46  ;;  %v2136_v51 = vrot.slane %v677_v46, %v1936_v44 }
  0x5f   :  { %v1713_v37 = vld [vmem:[%s2220_s11 + $0x1e0] sm:$0xff]   ;;  %v1717_v39 = vld [vmem:[%s2220_s11 + $0x1e8] sm:$0xff]   ;;  %v1721_v43 = vld [vmem:[%s2220_s11 + $0x1f0] sm:$0xff]  }
  0x60   :  { %1509 = vmatpush3.bf16.msra.mxu1 %v1688_v22  ;;  %v1715_v38 = vld [vmem:[%s2220_s11 + $0x1a0] sm:$0xff]   ;;  %v1719_v42 = vld [vmem:[%s2220_s11 + $0x1a8] sm:$0xff]   ;;  %v1723_v45 = vld [vmem:[%s2220_s11 + $0x1b0] sm:$0xff]   ;;  %v707_v50 = vrot.slane %v679_v48, %v1936_v44  ;;  %v709_v53 = vcombine.high %v2136_v51, %v2136_v51 }
  0x61   :  { %1603 = vmatpush3.bf16.msra.mxu0 %v1694_v26  ;;  %1538 = vmatprep.subr.bf16.mxu1 %v1697_v29  ;;  %v1725_v47 = vld [vmem:[%s2220_s11 + $0x1f8] sm:$0xff]   ;;  %v2143_v44 = vld [vmem:[%s2212_s3] sm:$0xff]  ;;  %v1702_v11 = vld [vmem:[%s2220_s11 + $0x148] sm:$0xff]  }
  0x62   :  { %1604 = vmatprep.subr.bf16.mxu0 %v1745_v2  ;;  %v1727_v49 = vld [vmem:[%s2220_s11 + $0x1b8] sm:$0xff]   ;;  %v711_v52 = vcombine.high %v707_v50, %v707_v50  ;;  %v1700_v9 = vld [vmem:[%s2220_s11 + $0x100] sm:$0xff]   ;;  %v1704_v12 = vld [vmem:[%s2220_s11 + $0x108] sm:$0xff]  }
  0x63   :  { %1177 = vmatmul.mubr.bf16.vlgmr.msra.gmra.mrb[8].mxu1 %v708_v23  ;;  %v1706_v13 = vld [vmem:[%s2220_s11 + $0x150] sm:$0xff]   ;;  %v1710_v15 = vld [vmem:[%s2220_s11 + $0x158] sm:$0xff]   ;;  %v1714_v17 = vld [vmem:[%s2220_s11 + $0x160] sm:$0xff]  }
  0x64   :  { %1539 = vmatpush3.bf16.msra.mxu1 %v1699_v31  ;;  %1256 = vmatprep.mubr.bf16.mxu1 %v711_v52  ;;  %v1708_v14 = vld [vmem:[%s2220_s11 + $0x110] sm:$0xff]   ;;  %v1712_v16 = vld [vmem:[%s2220_s11 + $0x118] sm:$0xff]   ;;  %v1716_v18 = vld [vmem:[%s2220_s11 + $0x120] sm:$0xff]   ;;  %v1266_v52 = vsub.s32 0, %v1925_v41 }
  0x65   :  { %1605 = vmatpush3.bf16.msra.mxu0 %v1695_v27  ;;  %v1718_v19 = vld [vmem:[%s2220_s11 + $0x168] sm:$0xff]   ;;  %v1722_v22 = vld [vmem:[%s2220_s11 + $0x170] sm:$0xff]   ;;  %v1728_v29 = vld [vmem:[%s2220_s11 + $0x138] sm:$0xff]  }
  0x66   :  { %1606 = vmatprep.subr.bf16.mxu0 %v1745_v2  ;;  %v1701_v2 = vld [vmem:[%s2220_s11 + $0x1c8] sm:$0xff]   ;;  %v1724_v27 = vld [vmem:[%s2220_s11 + $0x130] sm:$0xff]  }
  0x67   :  { %1540 = vmatprep.subr.bf16.mxu1 %v1701_v2  ;;  %v1720_v20 = vld [vmem:[%s2220_s11 + $0x128] sm:$0xff]  }
  0x68   :  { %1541 = vmatpush3.bf16.msra.mxu1 %v1703_v32 }
  0x69   :  { %1607 = vmatpush3.bf16.msra.mxu0 %v1696_v28  ;;  %1542 = vmatprep.subr.bf16.mxu1 %v1705_v33  ;;  %v1726_v28 = vld [vmem:[%s2220_s11 + $0x178] sm:$0xff]  }
  0x6a   :  { %1516 = vmatprep.subr.bf16.mxu0 %v1698_v30 }
  0x6c   :  { %1543 = vmatpush3.bf16.msra.mxu1 %v1707_v34 }
  0x6d   :  { %1544 = vmatprep.subr.bf16.mxu1 %v1709_v35 }
  0x70   :  { %1545 = vmatpush3.bf16.msra.mxu1 %v1711_v36 }
  0x71   :  { %1546 = vmatprep.subr.bf16.mxu1 %v1713_v37 }
  0x74   :  { %1547 = vmatpush3.bf16.msra.mxu1 %v1715_v38 }
  0x75   :  { %1548 = vmatprep.subr.bf16.mxu1 %v1717_v39 }
  0x78   :  { %1549 = vmatpush3.bf16.msra.mxu1 %v1719_v42 }
  0x79   :  { %1550 = vmatprep.subr.bf16.mxu1 %v1721_v43 }
  0x7c   :  { %1551 = vmatpush3.bf16.msra.mxu1 %v1723_v45 }
  0x7d   :  { %1552 = vmatprep.subr.bf16.mxu1 %v1725_v47 }
  0x80   :  { %1553 = vmatpush3.bf16.msra.mxu1 %v1727_v49 }
  0x83   :  { %1257 = vmatmul.mubr.bf16.vlgmr.msra.gmra.mrb[12].mxu1 %v709_v53  ;;  %v1272_v53 = vsub.s32 1, %v1925_v41 }
  0x88   :  { %v97_v54 = vpop.permute.xlu0 %96 }
  0x89   :  { %v347_v3 = vpop.permute.xlu1 %346 }
  0x8a   :  { %v349_v5 = vmul.f32 %v347_v3, %v2143_v44 }
  0x8c   :  { %v340_v6 = vpop.permute.xlu0 %339 }
  0xf5   :  { %v1443_v55 = vpop.f32.mrb[0].mxu0 }
  0xf6   :  { %v1444_v56 = vpop.f32.mrb[1].mxu0  ;;  %v328_v57 = vpop.f32.mrb[0].mxu1 }
  0xf7   :  { %v1445_v58 = vadd.f32 %v1444_v56, %v1443_v55  ;;  %v1446_v59 = vpop.f32.mrb[2].mxu0  ;;  %v1578_v60 = vpop.f32.mrb[1].mxu1 }
  0xf8   :  { %v1447_v61 = vpop.f32.mrb[3].mxu0  ;;  %v331_v62 = vpop.f32.mrb[2].mxu1 }
  0xf9   :  { %v289_v63 = vadd.f32 %v1445_v58, %v97_v54  ;;  %v1579_v0 = vpop.f32.mrb[3].mxu1 }
  0xfb   :  { %v329_v1 = vadd.f32 %v328_v57, %v289_v63 }
  0xfd   :  { %v334_v4 = vmul.f32 0.18215, %v329_v1  ;;  %v1284_v1 = vpop.permute.xlu1 %1283 }
  0xff   :  { %v342_v7 = vmul.f32 %v340_v6, %v334_v4 }
 0x101   :  { %v350_v8 = vadd.f32 %v349_v5, %v342_v7 }
 0x103   :  { %v351_v10 = vpack.c.bf16 %v350_v8, %v350_v8 }
 0x105   :  { %1609 = vmatmul.mubr.msk.bf16.vlgmr.msra.gmra.mrb[4].mxu0 %vm489_vm1, %v351_v10 }
 0x106   :  { %1517 = vmatpush3.bf16.msra.mxu0 %v1700_v9  ;;  %1216 = vmatprep.mubr.bf16.mxu0 %v707_v50 }
 0x107   :  { %1518 = vmatprep.subr.bf16.mxu0 %v1702_v11 }
 0x10a   :  { %1519 = vmatpush3.bf16.msra.mxu0 %v1704_v12 }
 0x10b   :  { %1520 = vmatprep.subr.bf16.mxu0 %v1706_v13 }
 0x10e   :  { %1521 = vmatpush3.bf16.msra.mxu0 %v1708_v14 }
 0x10f   :  { %1522 = vmatprep.subr.bf16.mxu0 %v1710_v15 }
 0x112   :  { %1523 = vmatpush3.bf16.msra.mxu0 %v1712_v16 }
 0x113   :  { %1524 = vmatprep.subr.bf16.mxu0 %v1714_v17 }
 0x116   :  { %1525 = vmatpush3.bf16.msra.mxu0 %v1716_v18  ;;  %v1488_v21 = vpop.f32.mrb[4].mxu1 }
 0x117   :  { %1526 = vmatprep.subr.bf16.mxu0 %v1718_v19  ;;  %v1489_v23 = vpop.f32.mrb[5].mxu1 }
 0x118   :  { %v1490_v24 = vadd.f32 %v1489_v23, %v1488_v21  ;;  %v1491_v25 = vpop.f32.mrb[6].mxu1 }
 0x119   :  { %v1492_v26 = vpop.f32.mrb[7].mxu1 }
 0x11a   :  { %1527 = vmatpush3.bf16.msra.mxu0 %v1720_v20 }
 0x11b   :  { %1528 = vmatprep.subr.bf16.mxu0 %v1722_v22 }
 0x11e   :  { %1529 = vmatpush3.bf16.msra.mxu0 %v1724_v27 }
 0x11f   :  { %1530 = vmatprep.subr.bf16.mxu0 %v1726_v28 }
 0x122   :  { %1531 = vmatpush3.bf16.msra.mxu0 %v1728_v29 }
 0x125   :  { %1217 = vmatmul.mubr.bf16.vlgmr.msra.gmra.mrb[8].mxu0 %v2136_v51 }
 0x136   :  { %v1510_v30 = vpop.f32.mrb[8].mxu1 }
 0x137   :  { %v1511_v31 = vpop.f32.mrb[9].mxu1 }
 0x138   :  { %v1512_v2 = vadd.f32 %v1511_v31, %v1510_v30  ;;  %v1513_v32 = vpop.f32.mrb[10].mxu1 }
 0x139   :  { %v1514_v33 = vpop.f32.mrb[11].mxu1 }
 0x13a   :  { %v1179_v34 = vadd.f32 %v1512_v2, %v1490_v24 }
 0x156   :  { %v1554_v35 = vpop.f32.mrb[12].mxu1 }
 0x157   :  { %v1555_v36 = vpop.f32.mrb[13].mxu1 }
 0x158   :  { %v1556_v37 = vadd.f32 %v1555_v36, %v1554_v35  ;;  %v1557_v38 = vpop.f32.mrb[14].mxu1 }
 0x159   :  { %v1558_v39 = vpop.f32.mrb[15].mxu1 }
 0x1d8   :  { %v527_v40 = vpop.f32.mrb[4].mxu0 }
 0x1d9   :  { %v1610_v42 = vpop.f32.mrb[5].mxu0 }
 0x1da   :  { %v530_v43 = vpop.f32.mrb[6].mxu0 }
 0x1db   :  { %v1611_v45 = vpop.f32.mrb[7].mxu0 }
 0x1f8   :  { %v1532_v46 = vpop.f32.mrb[8].mxu0 }
 0x1f9   :  { %v1533_v48 = vpop.f32.mrb[9].mxu0 }
 0x1fa   :  { %v1534_v47 = vadd.f32 %v1533_v48, %v1532_v46  ;;  %v1535_v49 = vpop.f32.mrb[10].mxu0 }
 0x1fb   :  { %v1536_v50 = vpop.f32.mrb[11].mxu0 }
 0x1fc   :  { %v1219_v51 = vadd.f32 %v1534_v47, %v1179_v34 }
 0x1fe   :  { %v1259_v54 = vadd.f32 %v1556_v37, %v1219_v51 }
 0x200   :  { %v1267_v55 = vrot.slane %v1259_v54, %v1266_v52  ;;  %v1273_v56 = vrot.slane %v1259_v54, %v1272_v53 }
 0x202   :  { %v1268_v57 = vadd.f32 %v1267_v55, %v527_v40  ;;  %v1274_v58 = vadd.f32 %v1273_v56, %v527_v40 }
 0x204   :  { %1729 = vtanh.f32 %v1268_v57 }
 0x205   :  { %1731 = vtanh.f32 %v1274_v58 }
 0x20e   :  { %v1730_v59 = vpop.eup %1729 }
 0x20f   :  { %v1732_v60 = vpop.eup %1731 }
 0x210   :  { %v1276_v61 = vsub.f32 %v1730_v59, %v1732_v60 }
 0x212   :  { %v1277_v62 = vmul.f32 4.0, %v1276_v61 }
 0x214   :  { %v1278_v63 = vadd.f32 %v1732_v60, %v1277_v62 }
 0x216   :  { %v1280_v0 = vsub.f32 %v1278_v63, %v2143_v44 }
 0x218   :  { %v1286_v3 = vmul.f32 %v1284_v1, %v1280_v0 }
 0x21a   :  { %vm1287_vm2 = vcmp.ne.f32.partialorder %v1286_v3, %v1286_v3 }
 0x21b   :  { %v1288_v4 = vsel %vm1287_vm2, 0.0, %v1286_v3 }
 0x21c   :  { %vm1289_vm3 = vcmp.eq.f32.partialorder %v1288_v4, inf }
 0x21d   :  { %v1290_v41 = vsel %vm1289_vm3, 3.4028235e+38, %v1288_v4 }
 0x21e   :  { %vm1291_vm4 = vcmp.eq.f32.partialorder %v1290_v41, -inf }
 0x21f   :  { %v1292_v5 = vsel %vm1291_vm4, -3.4028235e+38, %v1290_v41 }
 0x220   :  { %v1293_v6 = vmul.f32 %v1292_v5, %v1292_v5 }
 0x222   :  { %v1294_v7 = vsel %vm489_vm1, %v1293_v6, 0.0 }
 0x223   :  { %1295 = vadd.xlane.f32.xlu0 %v1294_v7 }
 0x2b0   :  { %v1296_v8 = vpop.xlane.xlu0 %1295 }
 0x2b1   :  { %v1297_v9 = vrot.slane %v1296_v8, 4 }
 0x2b3   :  { %v1298_v10 = vadd.f32 %v1297_v9, %v1296_v8 }
 0x2b5   :  { %v1299_v11 = vrot.slane %v1298_v10, 2 }
 0x2b7   :  { %v1300_v12 = vadd.f32 %v1299_v11, %v1298_v10 }
 0x2b9   :  { %v1301_v13 = vrot.slane %v1300_v12, 1 }
 0x2bb   :  { %v1302_v14 = vadd.f32 %v1301_v13, %v1300_v12 }
 0x2bd   :  { %1616 = vpush %v1302_v14 }
 0x2ee   :  { %s1617_s11 = spop %1616 }
 0x2ef   :  { %s1306_s5 = smul.f32 0.001953125, %s1617_s11 }
 0x2f1   :  { %s1307_s9 = smul.f32 0.5, %s1306_s5 }
 0x2f3   :  { %1309 = sst [smem:[#allocation2]] %s1307_s9 }
 0x2f4   :  { %1742 = shalt.err (!%p1739_p2)
}
 0x2f5   :  { %s1749_s27 = smov [#allocation2]  }
 0x2f6   :  { %1317 = dma.smem_to_hbm %s1749_s27, 16, %s2221_s12, [#allocation3]  }
 0x2f7   :  { %1743 = dma.done.wait [#allocation3], 16  }
 0x2f8   :  { %1744 = vsyncadd [#allocation3], 4294967280 }
 0x2f9   :  { %1321 = sfence }
 0x2fa   :  { %1322 = vsyncpa [#allocation3], 1 }

</bundles_post_ra>
